<compile_context>
chip_gen: v7x
topology: tpu7x:2x2x1
jax: 0.10.0
libtpu: 0.0.40
codegen_flags: <defaults>
</compile_context>

<pallas_src>
import jax
import jax.numpy as jnp
from jax import lax
from jax.experimental import pallas as pl
from jax.experimental.pallas import tpu as pltpu

TEMP = 0.07   # self.temp in BLIPCir


def _l2norm(x):
    # PyTorch F.normalize semantics: x / max(||x||, eps)
    n = jnp.sqrt(jnp.sum(x * x, axis=-1, keepdims=True))
    return x / jnp.maximum(n, 1e-12)


def _row_lse(x):
    mx = jnp.max(x, axis=-1, keepdims=True)
    return mx + jnp.log(jnp.sum(jnp.exp(x - mx), axis=-1, keepdims=True))


def _blip_cir_kernel(q1_ref, q2_ref, w_ref, b_ref, t_ref, m_ref, o_ref):
    # ---- text_proj for both captions: two MXU pushes, same resident weight ---
    w_bf = w_ref[...].astype(jnp.bfloat16)      # cast once, reused by both pushes
    bias = b_ref[...]                           # f32 [1, E]

    def proj(x_ref):
        y = jnp.dot(x_ref[...].astype(jnp.bfloat16), w_bf,
                    preferred_element_type=jnp.float32) + bias
        return _l2norm(y)                       # f32 normalize

    q1 = proj(q1_ref)                           # [B, E] f32
    q2 = proj(q2_ref)                           # [B, E] f32

    # query blend with the temperature folded into q once
    # (O(B*E) scale, not O(B^2) per contrastive call).
    q = (0.8 * q1 + 0.2 * q2) * (1.0 / TEMP)    # [B, E] f32
    q_bf = q.astype(jnp.bfloat16)

    # ---- target / multimodal features, normalized in f32 --------------------
    t = _l2norm(t_ref[...])                     # [B, E] f32
    m = _l2norm(m_ref[...])                     # [B, E] f32

    dn = (((1,), (1,)), ((), ()))               # contract on the feature dim

    def contrastive(tf):
        # diagonal logits directly from q·t (f32) — no eye mask, no gather
        diag = jnp.sum(q * tf, axis=-1, keepdims=True)                 # [B,1]
        # single bf16-operand sim matmul, f32 accumulation
        sim = lax.dot_general(q_bf, tf.astype(jnp.bfloat16), dn,
                              preferred_element_type=jnp.float32)      # [B,B]
        lse_qt = _row_lse(sim)          # query  -> target
        lse_tq = _row_lse(sim.T)        # target -> query: XLU transpose of the
                                        # SAME block, no second MXU matmul
        return 0.5 * (jnp.mean(lse_qt - diag) + jnp.mean(lse_tq - diag))

    o_ref[0] = 0.8 * contrastive(t) + 0.2 * contrastive(m)


def blip_cir_loss(q1_cls, q2_cls, w_proj, b_proj, tar_feat, mmemb):
    """Fused BLIPCir loss. Single grid-less block; everything fits in VMEM.

    No wrapper-side pad/concat/cast: the six arrays go straight into VMEM and
    all layout/precision work happens inside the kernel.
    """
    B, TW = q1_cls.shape
    E = w_proj.shape[1]
    b2 = jnp.reshape(b_proj, (1, E))

    # Explicit VMEM budget with headroom (defaults: 16 MiB v5e / 32 MiB v6e,v7x).
    f32 = 4
    in_bytes = (q1_cls.size + q2_cls.size + w_proj.size + b2.size
                + tar_feat.size + mmemb.size) * f32
    inter_bytes = (6 * B * E + 2 * B * B + 16 * B) * f32
    vmem_limit = int(min(100 << 20, max(4 << 20, 4 * (in_bytes + inter_bytes))))

    out = pl.pallas_call(
        _blip_cir_kernel,
        out_shape=jax.ShapeDtypeStruct((1,), jnp.float32),
        in_specs=[pl.BlockSpec(memory_space=pltpu.MemorySpace.VMEM)] * 6,
        # Scalar loss goes to SMEM: avoids a masked (8,128) VMEM tile writeback.
        out_specs=pl.BlockSpec(memory_space=pltpu.MemorySpace.SMEM),
        compiler_params=pltpu.CompilerParams(vmem_limit_bytes=vmem_limit),
    )(q1_cls, q2_cls, w_proj, b2, tar_feat, mmemb)
    return out[0]


# ----------------------------------------------------------------------------
# References
# ----------------------------------------------------------------------------
def blip_cir_loss_ref(q1_cls, q2_cls, w_proj, b_proj, tar_feat, mmemb):
    """Pure-JAX f32 reference with PyTorch-module semantics."""
    q1 = _l2norm(q1_cls @ w_proj + b_proj)
    q2 = _l2norm(q2_cls @ w_proj + b_proj)
    q = 0.8 * q1 + 0.2 * q2
    t = _l2norm(tar_feat)
    m = _l2norm(mmemb)

    def contrastive(qf, tf):
        sim = (qf @ tf.T) / TEMP
        labels = jnp.arange(sim.shape[0])
        lqt = jnp.mean(jax.nn.logsumexp(sim, axis=-1) - sim[labels, labels])
        ltq = jnp.mean(jax.nn.logsumexp(sim, axis=0) - sim[labels, labels])
        return 0.5 * (lqt + ltq)

    return 0.8 * contrastive(q, t) + 0.2 * contrastive(q, m)


def blip_cir_loss_ref_mixed(q1_cls, q2_cls, w_proj, b_proj, tar_feat, mmemb):
    """Pure-JAX reference mirroring the kernel's mixed-precision math
    (bf16 matmul operands, f32 accumulation / norms / LSE / diag)."""
    wb = w_proj.astype(jnp.bfloat16)
    bf = b_proj.reshape(1, -1).astype(jnp.float32)

    def proj(x):
        return jnp.dot(x.astype(jnp.bfloat16), wb,
                       preferred_element_type=jnp.float32) + bf

    q1 = _l2norm(proj(q1_cls))
    q2 = _l2norm(proj(q2_cls))
    q = (0.8 * q1 + 0.2 * q2) * (1.0 / TEMP)
    t = _l2norm(tar_feat.astype(jnp.float32))
    m = _l2norm(mmemb.astype(jnp.float32))

    def contrastive(qf, tf):
        diag = jnp.sum(qf * tf, axis=-1)
        sim = jnp.dot(qf.astype(jnp.bfloat16), tf.astype(jnp.bfloat16).T,
                      preferred_element_type=jnp.float32)
        lqt = jnp.mean(jax.nn.logsumexp(sim, axis=-1) - diag)
        ltq = jnp.mean(jax.nn.logsumexp(sim, axis=0) - diag)
        return 0.5 * (lqt + ltq)

    return 0.8 * contrastive(q, t) + 0.2 * contrastive(q, m)


if __name__ == "__main__":
    # Small synthetic shapes consistent with the forward:
    #   batch B, text_width TW (BERT hidden size), embed_dim E.
    B, TW, E = 8, 64, 32

    key = jax.random.PRNGKey(0)
    k1, k2, k3, k4, kw, kb = jax.random.split(key, 6)

    # Encoder CLS outputs (stand-ins for text_encoder(...).last_hidden_state[:,0,:]).
    q1_cls = jax.random.normal(k1, (B, TW), jnp.float32)   # caption branch
    q2_cls = jax.random.normal(k2, (B, TW), jnp.float32)   # webvid_caption branch
    # Target features from the batch.
    tar_feat = jax.random.normal(k3, (B, E), jnp.float32)
    mmemb = jax.random.normal(k4, (B, E), jnp.float32)

    # text_proj = nn.Linear(text_width, embed_dim); deterministic PyTorch-style init.
    bound = 1.0 / (TW ** 0.5)
    w_proj = jax.random.uniform(kw, (TW, E), jnp.float32, -bound, bound)
    b_proj = jax.random.uniform(kb, (1, E), jnp.float32, -bound, bound)

    loss = blip_cir_loss(q1_cls, q2_cls, w_proj, b_proj, tar_feat, mmemb)
    jax.block_until_ready(loss)

    ref_mixed = blip_cir_loss_ref_mixed(q1_cls, q2_cls, w_proj, b_proj, tar_feat, mmemb)
    ref_f32 = blip_cir_loss_ref(q1_cls, q2_cls, w_proj, b_proj, tar_feat, mmemb)

    assert jnp.isfinite(loss), "kernel produced non-finite loss"
    # Tight check against the bit-path-matched reference (lowering correctness).
    assert abs(float(loss) - float(ref_mixed)) < 2e-3, (float(loss), float(ref_mixed))
    # Loose check against the full-f32 PyTorch-semantics reference (bf16 operand error).
    assert abs(float(loss) - float(ref_f32)) < 1.5e-1 + 3e-2 * abs(float(ref_f32)), (
        float(loss), float(ref_f32))

    print("KERNEL_OK")
</pallas_src>

<mosaic_0001>
module attributes {stable_mosaic.version = 11 : i64} {
  func.func @_blip_cir_kernel(%arg0: memref<8x64xf32, #tpu.memory_space<vmem>>, %arg1: memref<8x64xf32, #tpu.memory_space<vmem>>, %arg2: memref<64x32xf32, #tpu.memory_space<vmem>>, %arg3: memref<1x32xf32, #tpu.memory_space<vmem>>, %arg4: memref<8x32xf32, #tpu.memory_space<vmem>>, %arg5: memref<8x32xf32, #tpu.memory_space<vmem>>, %arg6: memref<1xf32, #tpu.memory_space<smem>>) attributes {dimension_semantics = [], scalar_prefetch = 0 : i64, scratch_operands = 0 : i64, tpu.core_type = #tpu.core_type<tc>} {
    %c0 = arith.constant 0 : index
    %c0_0 = arith.constant 0 : index
    %0 = vector.load %arg2[%c0, %c0_0] : memref<64x32xf32, #tpu.memory_space<vmem>>, vector<64x32xf32>
    %1 = arith.truncf %0 : vector<64x32xf32> to vector<64x32xbf16>
    %c0_1 = arith.constant 0 : index
    %c0_2 = arith.constant 0 : index
    %2 = vector.load %arg3[%c0_1, %c0_2] : memref<1x32xf32, #tpu.memory_space<vmem>>, vector<1x32xf32>
    %c0_3 = arith.constant 0 : index
    %c0_4 = arith.constant 0 : index
    %3 = vector.load %arg0[%c0_3, %c0_4] : memref<8x64xf32, #tpu.memory_space<vmem>>, vector<8x64xf32>
    %4 = arith.truncf %3 : vector<8x64xf32> to vector<8x64xbf16>
    %cst = arith.constant dense<0.000000e+00> : vector<8x32xf32>
    %5 = tpu.matmul %4, %1, %cst {dimension_numbers = #tpu.dot_dimension_numbers<[1], [0], [0], [1], [0, 0, 1, 1], [], []>} : vector<8x64xbf16>, vector<64x32xbf16>, vector<8x32xf32> -> vector<8x32xf32>
    %6 = vector.broadcast %2 : vector<1x32xf32> to vector<8x32xf32>
    %7 = arith.addf %5, %6 : vector<8x32xf32>
    %8 = arith.mulf %7, %7 : vector<8x32xf32>
    %cst_5 = arith.constant dense<0.000000e+00> : vector<8xf32>
    %9 = vector.multi_reduction <add>, %8, %cst_5 [1] : vector<8x32xf32> to vector<8xf32>
    %10 = vector.shape_cast %9 : vector<8xf32> to vector<8x1xf32>
    %11 = math.sqrt %10 : vector<8x1xf32>
    %cst_6 = arith.constant 9.99999996E-13 : f32
    %12 = vector.broadcast %cst_6 : f32 to vector<8x1xf32>
    %13 = arith.maximumf %11, %12 : vector<8x1xf32>
    %14 = vector.broadcast %13 : vector<8x1xf32> to vector<8x32xf32>
    %15 = arith.divf %7, %14 : vector<8x32xf32>
    %c0_7 = arith.constant 0 : index
    %c0_8 = arith.constant 0 : index
    %16 = vector.load %arg1[%c0_7, %c0_8] : memref<8x64xf32, #tpu.memory_space<vmem>>, vector<8x64xf32>
    %17 = arith.truncf %16 : vector<8x64xf32> to vector<8x64xbf16>
    %cst_9 = arith.constant dense<0.000000e+00> : vector<8x32xf32>
    %18 = tpu.matmul %17, %1, %cst_9 {dimension_numbers = #tpu.dot_dimension_numbers<[1], [0], [0], [1], [0, 0, 1, 1], [], []>} : vector<8x64xbf16>, vector<64x32xbf16>, vector<8x32xf32> -> vector<8x32xf32>
    %19 = vector.broadcast %2 : vector<1x32xf32> to vector<8x32xf32>
    %20 = arith.addf %18, %19 : vector<8x32xf32>
    %21 = arith.mulf %20, %20 : vector<8x32xf32>
    %cst_10 = arith.constant dense<0.000000e+00> : vector<8xf32>
    %22 = vector.multi_reduction <add>, %21, %cst_10 [1] : vector<8x32xf32> to vector<8xf32>
    %23 = vector.shape_cast %22 : vector<8xf32> to vector<8x1xf32>
    %24 = math.sqrt %23 : vector<8x1xf32>
    %cst_11 = arith.constant 9.99999996E-13 : f32
    %25 = vector.broadcast %cst_11 : f32 to vector<8x1xf32>
    %26 = arith.maximumf %24, %25 : vector<8x1xf32>
    %27 = vector.broadcast %26 : vector<8x1xf32> to vector<8x32xf32>
    %28 = arith.divf %20, %27 : vector<8x32xf32>
    %cst_12 = arith.constant 8.000000e-01 : f32
    %29 = vector.broadcast %cst_12 : f32 to vector<8x32xf32>
    %30 = arith.mulf %29, %15 : vector<8x32xf32>
    %cst_13 = arith.constant 2.000000e-01 : f32
    %31 = vector.broadcast %cst_13 : f32 to vector<8x32xf32>
    %32 = arith.mulf %31, %28 : vector<8x32xf32>
    %33 = arith.addf %30, %32 : vector<8x32xf32>
    %cst_14 = arith.constant 14.2857141 : f32
    %34 = vector.broadcast %cst_14 : f32 to vector<8x32xf32>
    %35 = arith.mulf %33, %34 : vector<8x32xf32>
    %36 = arith.truncf %35 : vector<8x32xf32> to vector<8x32xbf16>
    %c0_15 = arith.constant 0 : index
    %c0_16 = arith.constant 0 : index
    %37 = vector.load %arg4[%c0_15, %c0_16] : memref<8x32xf32, #tpu.memory_space<vmem>>, vector<8x32xf32>
    %38 = arith.mulf %37, %37 : vector<8x32xf32>
    %cst_17 = arith.constant dense<0.000000e+00> : vector<8xf32>
    %39 = vector.multi_reduction <add>, %38, %cst_17 [1] : vector<8x32xf32> to vector<8xf32>
    %40 = vector.shape_cast %39 : vector<8xf32> to vector<8x1xf32>
    %41 = math.sqrt %40 : vector<8x1xf32>
    %cst_18 = arith.constant 9.99999996E-13 : f32
    %42 = vector.broadcast %cst_18 : f32 to vector<8x1xf32>
    %43 = arith.maximumf %41, %42 : vector<8x1xf32>
    %44 = vector.broadcast %43 : vector<8x1xf32> to vector<8x32xf32>
    %45 = arith.divf %37, %44 : vector<8x32xf32>
    %c0_19 = arith.constant 0 : index
    %c0_20 = arith.constant 0 : index
    %46 = vector.load %arg5[%c0_19, %c0_20] : memref<8x32xf32, #tpu.memory_space<vmem>>, vector<8x32xf32>
    %47 = arith.mulf %46, %46 : vector<8x32xf32>
    %cst_21 = arith.constant dense<0.000000e+00> : vector<8xf32>
    %48 = vector.multi_reduction <add>, %47, %cst_21 [1] : vector<8x32xf32> to vector<8xf32>
    %49 = vector.shape_cast %48 : vector<8xf32> to vector<8x1xf32>
    %50 = math.sqrt %49 : vector<8x1xf32>
    %cst_22 = arith.constant 9.99999996E-13 : f32
    %51 = vector.broadcast %cst_22 : f32 to vector<8x1xf32>
    %52 = arith.maximumf %50, %51 : vector<8x1xf32>
    %53 = vector.broadcast %52 : vector<8x1xf32> to vector<8x32xf32>
    %54 = arith.divf %46, %53 : vector<8x32xf32>
    %55 = arith.mulf %35, %45 : vector<8x32xf32>
    %cst_23 = arith.constant dense<0.000000e+00> : vector<8xf32>
    %56 = vector.multi_reduction <add>, %55, %cst_23 [1] : vector<8x32xf32> to vector<8xf32>
    %57 = vector.shape_cast %56 : vector<8xf32> to vector<8x1xf32>
    %58 = arith.truncf %45 : vector<8x32xf32> to vector<8x32xbf16>
    %cst_24 = arith.constant dense<0.000000e+00> : vector<8x8xf32>
    %59 = tpu.matmul %36, %58, %cst_24 {dimension_numbers = #tpu.dot_dimension_numbers<[1], [1], [0], [0], [0, 0, 1, 0], [], []>} : vector<8x32xbf16>, vector<8x32xbf16>, vector<8x8xf32> -> vector<8x8xf32>
    %cst_25 = arith.constant dense<0xFF800000> : vector<8xf32>
    %60 = vector.multi_reduction <maximumf>, %59, %cst_25 [1] : vector<8x8xf32> to vector<8xf32>
    %61 = vector.shape_cast %60 : vector<8xf32> to vector<8x1xf32>
    %62 = vector.broadcast %61 : vector<8x1xf32> to vector<8x8xf32>
    %63 = arith.subf %59, %62 : vector<8x8xf32>
    %64 = math.exp %63 : vector<8x8xf32>
    %cst_26 = arith.constant dense<0.000000e+00> : vector<8xf32>
    %65 = vector.multi_reduction <add>, %64, %cst_26 [1] : vector<8x8xf32> to vector<8xf32>
    %66 = vector.shape_cast %65 : vector<8xf32> to vector<8x1xf32>
    %67 = math.log %66 : vector<8x1xf32>
    %68 = arith.addf %61, %67 : vector<8x1xf32>
    %69 = tpu.transpose %59, [1, 0] : vector<8x8xf32> -> vector<8x8xf32>
    %cst_27 = arith.constant dense<0xFF800000> : vector<8xf32>
    %70 = vector.multi_reduction <maximumf>, %69, %cst_27 [1] : vector<8x8xf32> to vector<8xf32>
    %71 = vector.shape_cast %70 : vector<8xf32> to vector<8x1xf32>
    %72 = vector.broadcast %71 : vector<8x1xf32> to vector<8x8xf32>
    %73 = arith.subf %69, %72 : vector<8x8xf32>
    %74 = math.exp %73 : vector<8x8xf32>
    %cst_28 = arith.constant dense<0.000000e+00> : vector<8xf32>
    %75 = vector.multi_reduction <add>, %74, %cst_28 [1] : vector<8x8xf32> to vector<8xf32>
    %76 = vector.shape_cast %75 : vector<8xf32> to vector<8x1xf32>
    %77 = math.log %76 : vector<8x1xf32>
    %78 = arith.addf %71, %77 : vector<8x1xf32>
    %79 = arith.subf %68, %57 : vector<8x1xf32>
    %80 = vector.shape_cast %79 : vector<8x1xf32> to vector<1x8x1xf32>
    %cst_29 = arith.constant dense<0.000000e+00> : vector<1xf32>
    %81 = vector.multi_reduction <add>, %80, %cst_29 [1, 2] : vector<1x8x1xf32> to vector<1xf32>
    %82 = vector.shape_cast %81 : vector<1xf32> to vector<1x1x1xf32>
    %83 = vector.extract %82[0, 0, 0] : f32 from vector<1x1x1xf32>
    %cst_30 = arith.constant 8.000000e+00 : f32
    %84 = arith.divf %83, %cst_30 : f32
    %85 = arith.subf %78, %57 : vector<8x1xf32>
    %86 = vector.shape_cast %85 : vector<8x1xf32> to vector<1x8x1xf32>
    %cst_31 = arith.constant dense<0.000000e+00> : vector<1xf32>
    %87 = vector.multi_reduction <add>, %86, %cst_31 [1, 2] : vector<1x8x1xf32> to vector<1xf32>
    %88 = vector.shape_cast %87 : vector<1xf32> to vector<1x1x1xf32>
    %89 = vector.extract %88[0, 0, 0] : f32 from vector<1x1x1xf32>
    %cst_32 = arith.constant 8.000000e+00 : f32
    %90 = arith.divf %89, %cst_32 : f32
    %91 = arith.addf %84, %90 : f32
    %cst_33 = arith.constant 5.000000e-01 : f32
    %92 = arith.mulf %cst_33, %91 : f32
    %cst_34 = arith.constant 8.000000e-01 : f32
    %93 = arith.mulf %cst_34, %92 : f32
    %94 = arith.mulf %35, %54 : vector<8x32xf32>
    %cst_35 = arith.constant dense<0.000000e+00> : vector<8xf32>
    %95 = vector.multi_reduction <add>, %94, %cst_35 [1] : vector<8x32xf32> to vector<8xf32>
    %96 = vector.shape_cast %95 : vector<8xf32> to vector<8x1xf32>
    %97 = arith.truncf %54 : vector<8x32xf32> to vector<8x32xbf16>
    %cst_36 = arith.constant dense<0.000000e+00> : vector<8x8xf32>
    %98 = tpu.matmul %36, %97, %cst_36 {dimension_numbers = #tpu.dot_dimension_numbers<[1], [1], [0], [0], [0, 0, 1, 0], [], []>} : vector<8x32xbf16>, vector<8x32xbf16>, vector<8x8xf32> -> vector<8x8xf32>
    %cst_37 = arith.constant dense<0xFF800000> : vector<8xf32>
    %99 = vector.multi_reduction <maximumf>, %98, %cst_37 [1] : vector<8x8xf32> to vector<8xf32>
    %100 = vector.shape_cast %99 : vector<8xf32> to vector<8x1xf32>
    %101 = vector.broadcast %100 : vector<8x1xf32> to vector<8x8xf32>
    %102 = arith.subf %98, %101 : vector<8x8xf32>
    %103 = math.exp %102 : vector<8x8xf32>
    %cst_38 = arith.constant dense<0.000000e+00> : vector<8xf32>
    %104 = vector.multi_reduction <add>, %103, %cst_38 [1] : vector<8x8xf32> to vector<8xf32>
    %105 = vector.shape_cast %104 : vector<8xf32> to vector<8x1xf32>
    %106 = math.log %105 : vector<8x1xf32>
    %107 = arith.addf %100, %106 : vector<8x1xf32>
    %108 = tpu.transpose %98, [1, 0] : vector<8x8xf32> -> vector<8x8xf32>
    %cst_39 = arith.constant dense<0xFF800000> : vector<8xf32>
    %109 = vector.multi_reduction <maximumf>, %108, %cst_39 [1] : vector<8x8xf32> to vector<8xf32>
    %110 = vector.shape_cast %109 : vector<8xf32> to vector<8x1xf32>
    %111 = vector.broadcast %110 : vector<8x1xf32> to vector<8x8xf32>
    %112 = arith.subf %108, %111 : vector<8x8xf32>
    %113 = math.exp %112 : vector<8x8xf32>
    %cst_40 = arith.constant dense<0.000000e+00> : vector<8xf32>
    %114 = vector.multi_reduction <add>, %113, %cst_40 [1] : vector<8x8xf32> to vector<8xf32>
    %115 = vector.shape_cast %114 : vector<8xf32> to vector<8x1xf32>
    %116 = math.log %115 : vector<8x1xf32>
    %117 = arith.addf %110, %116 : vector<8x1xf32>
    %118 = arith.subf %107, %96 : vector<8x1xf32>
    %119 = vector.shape_cast %118 : vector<8x1xf32> to vector<1x8x1xf32>
    %cst_41 = arith.constant dense<0.000000e+00> : vector<1xf32>
    %120 = vector.multi_reduction <add>, %119, %cst_41 [1, 2] : vector<1x8x1xf32> to vector<1xf32>
    %121 = vector.shape_cast %120 : vector<1xf32> to vector<1x1x1xf32>
    %122 = vector.extract %121[0, 0, 0] : f32 from vector<1x1x1xf32>
    %cst_42 = arith.constant 8.000000e+00 : f32
    %123 = arith.divf %122, %cst_42 : f32
    %124 = arith.subf %117, %96 : vector<8x1xf32>
    %125 = vector.shape_cast %124 : vector<8x1xf32> to vector<1x8x1xf32>
    %cst_43 = arith.constant dense<0.000000e+00> : vector<1xf32>
    %126 = vector.multi_reduction <add>, %125, %cst_43 [1, 2] : vector<1x8x1xf32> to vector<1xf32>
    %127 = vector.shape_cast %126 : vector<1xf32> to vector<1x1x1xf32>
    %128 = vector.extract %127[0, 0, 0] : f32 from vector<1x1x1xf32>
    %cst_44 = arith.constant 8.000000e+00 : f32
    %129 = arith.divf %128, %cst_44 : f32
    %130 = arith.addf %123, %129 : f32
    %cst_45 = arith.constant 5.000000e-01 : f32
    %131 = arith.mulf %cst_45, %130 : f32
    %cst_46 = arith.constant 2.000000e-01 : f32
    %132 = arith.mulf %cst_46, %131 : f32
    %133 = arith.addf %93, %132 : f32
    %c0_47 = arith.constant 0 : index
    %134 = memref.load %arg6[%c0_47] : memref<1xf32, #tpu.memory_space<smem>>
    memref.store %133, %arg6[%c0_47] : memref<1xf32, #tpu.memory_space<smem>>
    return
  }
}

</mosaic_0001>

<bundles_post_ra>
// kernel: tpu_custom_call.1
= control target key start
LH: loop header
LB: loop body
LE: loop exit
PB: predicated region body
PF: predicated region fallthrough
CT: control target
= control target key end

     0   :  { %v600_v3 = vmov 0.0   ;;  %vm601_vm0 = vmmov 0   ;;  %vm91_vm1 = vcmask 261120   ;;  %s745_s0 = inlined_call_operand.vmem [shape: f32[8,64], index: 0, kind: input, shape index: {}]   ;;  %s746_s1 = inlined_call_operand.vmem [shape: f32[8,64], index: 1, kind: input, shape index: {}]   ;;  %s747_s2 = inlined_call_operand.vmem [shape: f32[64,32], index: 2, kind: input, shape index: {}]   ;;  %s748_s3 = inlined_call_operand.vmem [shape: f32[1,32], index: 3, kind: input, shape index: {}]   ;;  %s749_s4 = inlined_call_operand.vmem [shape: f32[8,32], index: 4, kind: input, shape index: {}]   ;;  %s750_s5 = inlined_call_operand.vmem [shape: f32[8,32], index: 5, kind: input, shape index: {}]   ;;  %s751_s6 = inlined_call_operand.hbm [shape: f32[1], index: 6, kind: output, shape index: {}]  }
   0x1   :  { %v25_v0 = vld [vmem:[%s747_s2] sm:$0xff]  ;;  %v26_v1 = vld [vmem:[%s747_s2 + $0x8] sm:$0xff]  ;;  %v27_v2 = vld [vmem:[%s747_s2 + $0x10] sm:$0xff]  ;;  %509 = vmatprep.subr.bf16.mxu0 %v600_v3  ;;  %521 = vmatprep.subr.bf16.mxu1 %v600_v3 }
   0x2   :  { %v33_v4 = vpack.c.bf16 %v26_v1, %v25_v0  ;;  %v28_v5 = vld [vmem:[%s747_s2 + $0x18] sm:$0xff]  ;;  %517 = vmatprep.mubr.msk.bf16.mxu0 %vm601_vm0, %v600_v3  ;;  %529 = vmatprep.mubr.msk.bf16.mxu1 %vm601_vm0, %v600_v3  ;;  %v655_v7 = vld [vmem:[%s749_s4] sm:$0xff]  ;;  %v30_v10 = vld [vmem:[%s747_s2 + $0x28] sm:$0xff] }
   0x3   :  { %v34_v6 = vpack.c.bf16 %v28_v5, %v27_v2  ;;  %v660_v8 = vld [vmem:[%s750_s5] sm:$0xff]  ;;  %v170_v11 = vmul.f32 %v655_v7, %v655_v7 }
   0x4   :  { %510 = vmatpush3.bf16.msra.mxu0 %v33_v4  ;;  %522 = vmatpush3.bf16.msra.mxu1 %v33_v4  ;;  %v29_v9 = vld [vmem:[%s747_s2 + $0x20] sm:$0xff] }
   0x5   :  { %511 = vmatprep.subr.bf16.mxu0 %v600_v3  ;;  %523 = vmatprep.subr.bf16.mxu1 %v600_v3 }
   0x6   :  { %11 = vsyncpa [#allocation3], 0  ;;  %v171_v12 = vsel %vm91_vm1, %v170_v11, 0.0  ;;  %v185_v13 = vmul.f32 %v660_v8, %v660_v8  ;;  %v35_v14 = vpack.c.bf16 %v30_v10, %v29_v9  ;;  %v31_v15 = vld [vmem:[%s747_s2 + $0x30] sm:$0xff]  ;;  %v32_v16 = vld [vmem:[%s747_s2 + $0x38] sm:$0xff]  ;;  %vm46_vm2 = vcmask 523264  }
   0x7   :  { %172 = vadd.xlane.f32.xlu0 %v171_v12  ;;  %v36_v18 = vpack.c.bf16 %v32_v16, %v31_v15  ;;  %v38_v19 = vld [vmem:[%s745_s0] sm:$0xff]  ;;  %vm250_vm11 = vcmask 64512   ;;  %vm308_vm12 = vcmask 7168   ;;  %s588_s10 = scalar_lea.hbm %s751_s6, 16 }
   0x8   :  { %512 = vmatpush3.bf16.msra.mxu0 %v34_v6  ;;  %524 = vmatpush3.bf16.msra.mxu1 %v34_v6  ;;  %v186_v17 = vsel %vm91_vm1, %v185_v13, 0.0  ;;  %v105_v20 = vld [vmem:[%s746_s1] sm:$0xff]  ;;  %v39_v21 = vpack.c.bf16 %v38_v19, %v38_v19  ;;  %p589_p0 = scmp.ne.s32.totalorder %s751_s6, %s588_s10  ;;  %p592_p1 = scmp.lt.u32.totalorder %s588_s10, %s751_s6 }
   0x9   :  { %513 = vmatprep.subr.bf16.mxu0 %v600_v3  ;;  %525 = vmatprep.subr.bf16.mxu1 %v600_v3  ;;  %v106_v22 = vpack.c.bf16 %v105_v20, %v105_v20  ;;  %v490_v24 = vld [vmem:[%s748_s3] ss:$0 sm:$0xff] }
   0xa   :  { %p594_p2 = pnand %p592_p1, %p589_p0 }
   0xb   :  { %187 = vadd.xlane.f32.xlu0 %v186_v17 }
   0xc   :  { %514 = vmatpush3.bf16.msra.mxu0 %v35_v14  ;;  %526 = vmatpush3.bf16.msra.mxu1 %v35_v14 }
   0xd   :  { %515 = vmatprep.subr.bf16.mxu0 %v600_v3  ;;  %527 = vmatprep.subr.bf16.mxu1 %v600_v3 }
  0x10   :  { %516 = vmatpush3.bf16.msra.mxu0 %v36_v18  ;;  %528 = vmatpush3.bf16.msra.mxu1 %v36_v18 }
  0x11   :  { %533 = vmatprep.subr.bf16.mxu0 %v600_v3  ;;  %539 = vmatprep.subr.bf16.mxu1 %v600_v3 }
  0x13   :  { %518 = vmatmul.mubr.msk.bf16.vlgmr.msra.gmra.mrb[0].mxu0 %vm46_vm2, %v39_v21  ;;  %530 = vmatmul.mubr.msk.bf16.vlgmr.msra.gmra.mrb[0].mxu1 %vm46_vm2, %v106_v22 }
  0x14   :  { %535 = vmatprep.mubr.msk.bf16.mxu0 %vm601_vm0, %v600_v3  ;;  %541 = vmatprep.mubr.msk.bf16.mxu1 %vm601_vm0, %v600_v3 }
  0x94   :  { %v173_v23 = vpop.xlane.xlu0 %172 }
  0x95   :  { %556 = vrsqrt.f32 %v173_v23  ;;  %vm176_vm3 = vcmp.eq.f32.partialorder %v173_v23, inf  ;;  %v179_v43 = vand.u32 2147483648, %v173_v23  ;;  %vm178_vm4 = vcmp.eq.f32.partialorder %v173_v23, 0.0 }
  0x98   :  { %v188_v25 = vpop.xlane.xlu0 %187 }
  0x99   :  { %558 = vrsqrt.f32 %v188_v25  ;;  %vm191_vm5 = vcmp.eq.f32.partialorder %v188_v25, inf  ;;  %v194_v47 = vand.u32 2147483648, %v188_v25  ;;  %vm193_vm6 = vcmp.eq.f32.partialorder %v188_v25, 0.0 }
  0x9f   :  { %v557_v39 = vpop.eup %556 }
  0xa0   :  { %v175_v41 = vmul.f32 %v557_v39, %v173_v23 }
  0xa2   :  { %v177_v44 = vsel %vm176_vm3, %v173_v23, %v175_v41 }
  0xa3   :  { %v559_v42 = vpop.eup %558  ;;  %v180_v46 = vsel %vm178_vm4, %v179_v43, %v177_v44 }
  0xa4   :  { %v190_v45 = vmul.f32 %v559_v42, %v188_v25  ;;  %v181_v49 = vmax.f32 %v180_v46, 1e-12 }
  0xa6   :  { %v192_v48 = vsel %vm191_vm5, %v188_v25, %v190_v45  ;;  %560 = vrcp.f32 %v181_v49 }
  0xa7   :  { %v195_v50 = vsel %vm193_vm6, %v194_v47, %v192_v48 }
  0xa8   :  { %v196_v51 = vmax.f32 %v195_v50, 1e-12 }
  0xaa   :  { %562 = vrcp.f32 %v196_v51 }
  0xb0   :  { %v561_v52 = vpop.eup %560 }
  0xb1   :  { %v702_v53 = vmul.f32 %v561_v52, %v655_v7 }
  0xb3   :  { %v203_v55 = vpack.c.bf16 %v702_v53, %v702_v53 }
  0xb4   :  { %v563_v54 = vpop.eup %562 }
  0xb5   :  { %v208_v56 = vsel %vm91_vm1, %v203_v55, 0  ;;  %v708_v57 = vmul.f32 %v563_v54, %v660_v8 }
  0xb6   :  { %534 = vmatpush3.bf16.xpose.msra.mxu0 %v208_v56 }
  0xb7   :  { %v343_v58 = vpack.c.bf16 %v708_v57, %v708_v57 }
  0xb9   :  { %v345_v59 = vsel %vm91_vm1, %v343_v58, 0 }
  0xba   :  { %540 = vmatpush3.bf16.xpose.msra.mxu1 %v345_v59 }
  0xe6   :  { %v84_v26 = vpop.f32.mrb[0].mxu0  ;;  %v144_v27 = vpop.f32.mrb[0].mxu1 }
  0xe7   :  { %v691_v28 = vadd.f32 %v490_v24, %v84_v26  ;;  %v519_v29 = vpop.f32.mrb[1].mxu0  ;;  %v693_v30 = vadd.f32 %v490_v24, %v144_v27  ;;  %v531_v31 = vpop.f32.mrb[1].mxu1 }
  0xe8   :  { %v87_v32 = vpop.f32.mrb[2].mxu0  ;;  %v147_v33 = vpop.f32.mrb[2].mxu1 }
  0xe9   :  { %v520_v34 = vpop.f32.mrb[3].mxu0  ;;  %v532_v35 = vpop.f32.mrb[3].mxu1  ;;  %v90_v36 = vmul.f32 %v691_v28, %v691_v28  ;;  %v150_v37 = vmul.f32 %v693_v30, %v693_v30 }
  0xeb   :  { %v92_v38 = vsel %vm91_vm1, %v90_v36, 0.0  ;;  %v151_v40 = vsel %vm91_vm1, %v150_v37, 0.0 }
  0xec   :  { %93 = vadd.xlane.f32.xlu1 %v92_v38 }
  0xf0   :  { %152 = vadd.xlane.f32.xlu1 %v151_v40 }
 0x179   :  { %v94_v60 = vpop.xlane.xlu1 %93 }
 0x17a   :  { %564 = vrsqrt.f32 %v94_v60  ;;  %vm97_vm7 = vcmp.eq.f32.partialorder %v94_v60, inf  ;;  %v100_v0 = vand.u32 2147483648, %v94_v60  ;;  %vm99_vm8 = vcmp.eq.f32.partialorder %v94_v60, 0.0 }
 0x17d   :  { %v153_v61 = vpop.xlane.xlu1 %152 }
 0x17e   :  { %566 = vrsqrt.f32 %v153_v61  ;;  %vm156_vm9 = vcmp.eq.f32.partialorder %v153_v61, inf  ;;  %v159_v6 = vand.u32 2147483648, %v153_v61  ;;  %vm158_vm10 = vcmp.eq.f32.partialorder %v153_v61, 0.0 }
 0x184   :  { %v565_v62 = vpop.eup %564 }
 0x185   :  { %v96_v63 = vmul.f32 %v565_v62, %v94_v60 }
 0x187   :  { %v98_v1 = vsel %vm97_vm7, %v94_v60, %v96_v63 }
 0x188   :  { %v567_v2 = vpop.eup %566  ;;  %v101_v3 = vsel %vm99_vm8, %v100_v0, %v98_v1 }
 0x189   :  { %v102_v4 = vmax.f32 %v101_v3, 1e-12  ;;  %v155_v5 = vmul.f32 %v567_v2, %v153_v61 }
 0x18b   :  { %568 = vrcp.f32 %v102_v4  ;;  %v157_v7 = vsel %vm156_vm9, %v153_v61, %v155_v5 }
 0x18c   :  { %v160_v8 = vsel %vm158_vm10, %v159_v6, %v157_v7 }
 0x18d   :  { %v161_v9 = vmax.f32 %v160_v8, 1e-12 }
 0x18f   :  { %570 = vrcp.f32 %v161_v9 }
 0x195   :  { %v569_v10 = vpop.eup %568 }
 0x196   :  { %v104_v11 = vmul.f32 %v569_v10, %v691_v28 }
 0x198   :  { %v164_v14 = vmul.f32 0.8, %v104_v11 }
 0x199   :  { %v571_v12 = vpop.eup %570 }
 0x19a   :  { %v163_v13 = vmul.f32 %v571_v12, %v693_v30 }
 0x19c   :  { %v165_v15 = vmul.f32 0.2, %v163_v13 }
 0x19e   :  { %v166_v16 = vadd.f32 %v165_v15, %v164_v14 }
 0x1a0   :  { %v167_v17 = vmul.f32 14.285714, %v166_v16 }
 0x1a2   :  { %v168_v18 = vpack.c.bf16 %v167_v17, %v167_v17  ;;  %v199_v43 = vmul.f32 %v702_v53, %v167_v17  ;;  %v339_v53 = vmul.f32 %v708_v57, %v167_v17 }
 0x1a4   :  { %536 = vmatmul.mubr.msk.bf16.vlgmr.msra.gmra.mrb[4].mxu0 %vm91_vm1, %v168_v18  ;;  %542 = vmatmul.mubr.msk.bf16.vlgmr.msra.gmra.mrb[4].mxu1 %vm91_vm1, %v168_v18  ;;  %v200_v44 = vsel %vm91_vm1, %v199_v43, 0.0  ;;  %v340_v56 = vsel %vm91_vm1, %v339_v53, 0.0 }
 0x277   :  { %v244_v19 = vpop.f32.mrb[4].mxu0  ;;  %v381_v20 = vpop.f32.mrb[4].mxu1 }
 0x278   :  { %399 = vxpose.xlu1.b32.start.end [1/1] (short) (narrow) %v381_v20, 8  ;;  %v543_v21 = vpop.f32.mrb[5].mxu1  ;;  %263 = vxpose.xlu0.b32.start.end [1/1] (short) (narrow) %v244_v19, 8  ;;  %v537_v22 = vpop.f32.mrb[5].mxu0  ;;  %v251_v27 = vsel %vm250_vm11, %v244_v19, -inf  ;;  %v387_v28 = vsel %vm250_vm11, %v381_v20, -inf }
 0x279   :  { %v247_v23 = vpop.f32.mrb[6].mxu0  ;;  %v384_v24 = vpop.f32.mrb[6].mxu1 }
 0x27a   :  { %v538_v25 = vpop.f32.mrb[7].mxu0  ;;  %v544_v26 = vpop.f32.mrb[7].mxu1 }
 0x2a5   :  { %252 = vmax.xlane.f32.xlu0 %v251_v27 }
 0x2a9   :  { %388 = vmax.xlane.f32.xlu0 %v387_v28 }
 0x2f8   :  { %v279_v29 = vpop.trf.xlu0  ;;  %v415_v30 = vpop.trf.xlu1 }
 0x2f9   :  { %v295_v31 = vsel %vm250_vm11, %v279_v29, -inf  ;;  %v431_v32 = vsel %vm250_vm11, %v415_v30, -inf }
 0x2fa   :  { %296 = vmax.xlane.f32.xlu1 %v295_v31 }
 0x2fe   :  { %432 = vmax.xlane.f32.xlu1 %v431_v32 }
 0x332   :  { %v253_v33 = vpop.xlane.xlu0 %252 }
 0x333   :  { %v254_v34 = vsub.f32 %v244_v19, %v253_v33 }
 0x335   :  { %v255_v35 = vmul.f32 1.442695, %v254_v34 }
 0x336   :  { %v389_v36 = vpop.xlane.xlu0 %388 }
 0x337   :  { %572 = vpow2.f32 %v255_v35  ;;  %v390_v37 = vsub.f32 %v381_v20, %v389_v36 }
 0x339   :  { %v391_v38 = vmul.f32 1.442695, %v390_v37 }
 0x33b   :  { %574 = vpow2.f32 %v391_v38 }
 0x341   :  { %v573_v39 = vpop.eup %572 }
 0x342   :  { %v257_v40 = vsel %vm250_vm11, %v573_v39, 0.0 }
 0x343   :  { %258 = vadd.xlane.f32.xlu0 %v257_v40 }
 0x345   :  { %v575_v41 = vpop.eup %574 }
 0x346   :  { %v393_v42 = vsel %vm250_vm11, %v575_v41, 0.0 }
 0x347   :  { %394 = vadd.xlane.f32.xlu0 %v393_v42 }
 0x34b   :  { %201 = vadd.xlane.f32.xlu0 %v200_v44 }
 0x387   :  { %v297_v45 = vpop.xlane.xlu1 %296 }
 0x388   :  { %v298_v46 = vsub.f32 %v279_v29, %v297_v45 }
 0x38a   :  { %v299_v47 = vmul.f32 1.442695, %v298_v46 }
 0x38b   :  { %v433_v48 = vpop.xlane.xlu1 %432 }
 0x38c   :  { %576 = vpow2.f32 %v299_v47  ;;  %v434_v49 = vsub.f32 %v415_v30, %v433_v48 }
 0x38e   :  { %v435_v50 = vmul.f32 1.442695, %v434_v49 }
 0x390   :  { %578 = vpow2.f32 %v435_v50 }
 0x396   :  { %v577_v51 = vpop.eup %576 }
 0x397   :  { %v301_v52 = vsel %vm250_vm11, %v577_v51, 0.0 }
 0x398   :  { %302 = vadd.xlane.f32.xlu1 %v301_v52 }
 0x39a   :  { %v579_v54 = vpop.eup %578 }
 0x39b   :  { %v437_v55 = vsel %vm250_vm11, %v579_v54, 0.0 }
 0x39c   :  { %438 = vadd.xlane.f32.xlu1 %v437_v55 }
 0x3a0   :  { %341 = vadd.xlane.f32.xlu1 %v340_v56 }
 0x3d0   :  { %v259_v58 = vpop.xlane.xlu0 %258 }
 0x3d1   :  { %580 = vlog2.f32 %v259_v58 }
 0x3d4   :  { %v395_v59 = vpop.xlane.xlu0 %394 }
 0x3d5   :  { %582 = vlog2.f32 %v395_v59 }
 0x3d8   :  { %v202_v63 = vpop.xlane.xlu0 %201 }
 0x3db   :  { %v581_v60 = vpop.eup %580 }
 0x3dc   :  { %v261_v61 = vmul.f32 0.6931472, %v581_v60 }
 0x3de   :  { %v262_v62 = vadd.f32 %v261_v61, %v253_v33 }
 0x3df   :  { %v583_v2 = vpop.eup %582 }
 0x3e0   :  { %v307_v0 = vsub.f32 %v262_v62, %v202_v63  ;;  %v397_v57 = vmul.f32 0.6931472, %v583_v2 }
 0x3e2   :  { %v309_v1 = vsel %vm308_vm12, %v307_v0, 0.0  ;;  %v398_v5 = vadd.f32 %v397_v57, %v389_v36 }
 0x3e3   :  { %310 = vadd.xlane.f32.xlu0 %v309_v1 }
 0x425   :  { %v303_v3 = vpop.xlane.xlu1 %302 }
 0x426   :  { %584 = vlog2.f32 %v303_v3 }
 0x429   :  { %v439_v4 = vpop.xlane.xlu1 %438 }
 0x42a   :  { %586 = vlog2.f32 %v439_v4 }
 0x42d   :  { %v342_v6 = vpop.xlane.xlu1 %341 }
 0x42e   :  { %v443_v7 = vsub.f32 %v398_v5, %v342_v6 }
 0x430   :  { %v585_v8 = vpop.eup %584  ;;  %v444_v9 = vsel %vm308_vm12, %v443_v7, 0.0 }
 0x431   :  { %v305_v10 = vmul.f32 0.6931472, %v585_v8  ;;  %445 = vadd.xlane.f32.xlu0 %v444_v9 }
 0x433   :  { %v306_v11 = vadd.f32 %v305_v10, %v297_v45 }
 0x434   :  { %v587_v12 = vpop.eup %586 }
 0x435   :  { %v441_v13 = vmul.f32 0.6931472, %v587_v12  ;;  %v322_v14 = vsub.f32 %v306_v11, %v202_v63 }
 0x437   :  { %v442_v15 = vadd.f32 %v441_v13, %v433_v48  ;;  %v323_v16 = vsel %vm308_vm12, %v322_v14, 0.0 }
 0x438   :  { %324 = vadd.xlane.f32.xlu1 %v323_v16 }
 0x439   :  { %v457_v17 = vsub.f32 %v442_v15, %v342_v6 }
 0x43b   :  { %v458_v18 = vsel %vm308_vm12, %v457_v17, 0.0 }
 0x43c   :  { %459 = vadd.xlane.f32.xlu1 %v458_v18 }
 0x470   :  { %v311_v19 = vpop.xlane.xlu0 %310 }
 0x471   :  { %v312_v20 = vrot.slane %v311_v19, 4 }
 0x473   :  { %v313_v21 = vadd.f32 %v312_v20, %v311_v19 }
 0x475   :  { %v314_v22 = vrot.slane %v313_v21, 2 }
 0x477   :  { %v315_v23 = vadd.f32 %v314_v22, %v313_v21 }
 0x479   :  { %v316_v24 = vrot.slane %v315_v23, 1 }
 0x47b   :  { %v317_v25 = vadd.f32 %v316_v24, %v315_v23 }
 0x47d   :  { %545 = vpush %v317_v25 }
 0x4ae   :  { %s546_s2 = spop %545 }
 0x4af   :  { %s321_s3 = smul.f32 0.125, %s546_s2 }
 0x4be   :  { %v446_v26 = vpop.xlane.xlu0 %445 }
 0x4bf   :  { %v447_v27 = vrot.slane %v446_v26, 4 }
 0x4c1   :  { %v448_v28 = vadd.f32 %v447_v27, %v446_v26 }
 0x4c3   :  { %v449_v29 = vrot.slane %v448_v28, 2 }
 0x4c5   :  { %v325_v30 = vpop.xlane.xlu1 %324  ;;  %v450_v33 = vadd.f32 %v449_v29, %v448_v28 }
 0x4c6   :  { %v326_v31 = vrot.slane %v325_v30, 4 }
 0x4c7   :  { %v451_v39 = vrot.slane %v450_v33, 1 }
 0x4c8   :  { %v327_v32 = vadd.f32 %v326_v31, %v325_v30 }
 0x4c9   :  { %v460_v34 = vpop.xlane.xlu1 %459  ;;  %v452_v44 = vadd.f32 %v451_v39, %v450_v33 }
 0x4ca   :  { %v328_v35 = vrot.slane %v327_v32, 2  ;;  %v461_v36 = vrot.slane %v460_v34, 4 }
 0x4cc   :  { %v462_v37 = vadd.f32 %v461_v36, %v460_v34  ;;  %v329_v38 = vadd.f32 %v328_v35, %v327_v32 }
 0x4ce   :  { %v463_v40 = vrot.slane %v462_v37, 2  ;;  %v330_v41 = vrot.slane %v329_v38, 1 }
 0x4d0   :  { %v464_v42 = vadd.f32 %v463_v40, %v462_v37  ;;  %v331_v43 = vadd.f32 %v330_v41, %v329_v38 }
 0x4d2   :  { %547 = vpush %v331_v43  ;;  %v465_v45 = vrot.slane %v464_v42, 1 }
 0x4d3   :  { %549 = vpush %v452_v44 }
 0x4d4   :  { %v466_v46 = vadd.f32 %v465_v45, %v464_v42 }
 0x4d6   :  { %551 = vpush %v466_v46 }
 0x503   :  { %s548_s19 = spop %547 }
 0x504   :  { %s335_s20 = smul.f32 0.125, %s548_s19  ;;  %s550_s21 = spop %549 }
 0x505   :  { %s456_s24 = smul.f32 0.125, %s550_s21 }
 0x506   :  { %s336_s22 = sadd.f32 %s335_s20, %s321_s3 }
 0x507   :  { %s552_s23 = spop %551 }
 0x508   :  { %s470_s25 = smul.f32 0.125, %s552_s23 }
 0x509   :  { %s337_s26 = smul.f32 0.5, %s336_s22 }
 0x50a   :  { %s471_s27 = sadd.f32 %s470_s25, %s456_s24 }
 0x50b   :  { %s338_s29 = smul.f32 0.8, %s337_s26 }
 0x50c   :  { %s472_s28 = smul.f32 0.5, %s471_s27 }
 0x50e   :  { %s473_s30 = smul.f32 0.2, %s472_s28 }
 0x510   :  { %s474_s7 = sadd.f32 %s473_s30, %s338_s29 }
 0x512   :  { %476 = sst [smem:[#allocation2]] %s474_s7 }
 0x513   :  { %597 = shalt.err (!%p594_p2)
}
 0x514   :  { %s602_s13 = smov [#allocation2]  }
 0x515   :  { %484 = dma.smem_to_hbm %s602_s13, 16, %s751_s6, [#allocation3]  }
 0x516   :  { %598 = dma.done.wait [#allocation3], 16  }
 0x517   :  { %599 = vsyncadd [#allocation3], 4294967280 }
 0x518   :  { %488 = sfence }
 0x519   :  { %489 = vsyncpa [#allocation3], 1 }

</bundles_post_ra>
